<compile_context>
chip_gen: v7x
topology: tpu7x:2x2x1
jax: 0.10.0
libtpu: 0.0.40
codegen_flags: <defaults>
</compile_context>

<pallas_src>
import math
from functools import partial

import jax
import jax.numpy as jnp
from jax.experimental import pallas as pl
from jax.experimental.pallas import tpu as pltpu


# ---------------------------------------------------------------------------
# VMEM budget (generation-aware) and tile-size helpers
# ---------------------------------------------------------------------------

def _round_up(x, m):
    return ((x + m - 1) // m) * m


def _detect_vmem_limit():
    # v5e/v6e: 128 MiB physical -> ~96 MiB scoped; v7x: 64 MiB -> 48 MiB.
    try:
        info = pltpu.get_tpu_info()
        cap = int(getattr(info, "vmem_capacity_bytes", 0) or 0)
        if cap > 0:
            return int(min(max(cap * 3 // 4, 32 * 1024 * 1024),
                           100 * 1024 * 1024))
    except Exception:
        pass
    return 32 * 1024 * 1024


_VMEM_LIMIT = _detect_vmem_limit()
_CONV_ROW_TILE = 2048          # flattened output rows per conv grid step
_ATTN_TQ_CAP = 512
_ATTN_TK_CAP = 1024


def _compiler_params(semantics):
    return pltpu.CompilerParams(dimension_semantics=semantics,
                                vmem_limit_bytes=_VMEM_LIMIT)


def _pick_tm(m, k, n, out_bytes=2):
    """M tile for a [M,K]@[K,N] GEMM.

    Sized from the VMEM budget (double-buffered x/out tiles + weights + f32
    accumulator) and, when tiling is needed, preferably a divisor of M so the
    wrapper never pads/slices the activation tensor in HBM.
    Returns (tm, padded_m)."""
    budget = min(_VMEM_LIMIT // 2, 20 * 1024 * 1024)
    cap = 2048
    while cap > 64:
        per_step = (2 * cap * k * 2                    # bf16 x tile, 2 buffers
                    + k * n * 2                        # bf16 weights
                    + 2 * cap * n * max(out_bytes, 2)  # out tile, 2 buffers
                    + cap * n * 4)                     # f32 accumulator
        if per_step <= budget:
            break
        cap //= 2
    cap = max(cap, 8)
    if m <= cap:
        return m, m
    t = (min(cap, m) // 8) * 8
    while t >= 8:
        if m % t == 0:
            return t, m
        t -= 8
    return cap, _round_up(m, cap)


def _maybe_pad_rows(x, mp):
    m = x.shape[0]
    return x if mp == m else jnp.pad(x, ((0, mp - m), (0, 0)))


def _attn_tile(l, cap):
    return min(cap, _round_up(l, 8))


# ---------------------------------------------------------------------------
# Pallas kernels: GEMM family
# ---------------------------------------------------------------------------

def _mm_bias_act_kernel(x_ref, w_ref, b_ref, o_ref, *, act):
    acc = jnp.dot(x_ref[...], w_ref[...], preferred_element_type=jnp.float32)
    acc = acc + b_ref[...]
    if act == "relu":
        acc = jnp.maximum(acc, 0.0)
    elif act == "gelu":
        # TODO(synk): tanh-approx GELU (PyTorch nn.GELU default is erf); kept
        # tanh for guaranteed Mosaic lowering, ~1e-3 drift per FFN.
        acc = jax.nn.gelu(acc, approximate=True)
    o_ref[...] = acc.astype(o_ref.dtype)


def linear_pallas(x, w, b=None, act=None, out_dtype=jnp.bfloat16):
    """x: [M, K] @ w: [K, N] (+ bias, + activation), M-tiled, bf16 MXU, f32 acc."""
    m, k = x.shape
    k2, n = w.shape
    assert k == k2
    tm, mp = _pick_tm(m, k, n, out_bytes=jnp.dtype(out_dtype).itemsize)
    xb = _maybe_pad_rows(x.astype(jnp.bfloat16), mp)
    bias = (b if b is not None else jnp.zeros((n,), jnp.float32))
    bias = bias.reshape(1, n).astype(jnp.float32)
    out = pl.pallas_call(
        partial(_mm_bias_act_kernel, act=act),
        out_shape=jax.ShapeDtypeStruct((mp, n), out_dtype),
        grid=(mp // tm,),
        in_specs=[
            pl.BlockSpec((tm, k), lambda i: (i, 0)),
            pl.BlockSpec((k, n), lambda i: (0, 0)),
            pl.BlockSpec((1, n), lambda i: (0, 0)),
        ],
        out_specs=pl.BlockSpec((tm, n), lambda i: (i, 0)),
        compiler_params=_compiler_params(("parallel",)),
    )(xb, w.astype(jnp.bfloat16), bias)
    return out[:m] if mp != m else out


def _mm_multi_kernel(x_ref, w_ref, *o_refs, splits):
    acc = jnp.dot(x_ref[...], w_ref[...], preferred_element_type=jnp.float32)
    off = 0
    for o_ref, sz in zip(o_refs, splits):
        o_ref[...] = acc[:, off:off + sz].astype(o_ref.dtype)
        off += sz


def linear_multi_pallas(x, w, splits, out_dtype=jnp.bfloat16):
    """One fused [M,K]@[K,sum(splits)] GEMM emitting each split as its own output
    array (no XLA lane-slice copies)."""
    m, k = x.shape
    n = w.shape[1]
    assert sum(splits) == n
    tm, mp = _pick_tm(m, k, n, out_bytes=jnp.dtype(out_dtype).itemsize)
    xb = _maybe_pad_rows(x.astype(jnp.bfloat16), mp)
    outs = pl.pallas_call(
        partial(_mm_multi_kernel, splits=tuple(splits)),
        out_shape=tuple(jax.ShapeDtypeStruct((mp, sz), out_dtype) for sz in splits),
        grid=(mp // tm,),
        in_specs=[
            pl.BlockSpec((tm, k), lambda i: (i, 0)),
            pl.BlockSpec((k, n), lambda i: (0, 0)),
        ],
        out_specs=[pl.BlockSpec((tm, sz), lambda i: (i, 0)) for sz in splits],
        compiler_params=_compiler_params(("parallel",)),
    )(xb, w.astype(jnp.bfloat16))
    if mp != m:
        outs = tuple(o[:m] for o in outs)
    return tuple(outs)


def _mm_ln_kernel(x_ref, w_ref, g_ref, b_ref, *rest, eps, has_residual):
    if has_residual:
        r_ref, o_ref = rest
    else:
        (o_ref,) = rest
    acc = jnp.dot(x_ref[...], w_ref[...], preferred_element_type=jnp.float32)
    mean = jnp.mean(acc, axis=-1, keepdims=True)
    var = jnp.mean(jnp.square(acc - mean), axis=-1, keepdims=True)
    y = (acc - mean) * jax.lax.rsqrt(var + eps)
    y = y * g_ref[...] + b_ref[...]
    if has_residual:
        y = y + r_ref[...].astype(jnp.float32)
    o_ref[...] = y.astype(o_ref.dtype)


def mm_ln_pallas(x, w, gamma, beta, residual=None, eps=1e-5,
                 out_dtype=jnp.bfloat16):
    """(x @ w) -> LayerNorm(gamma, beta) (+ residual), fused in one kernel."""
    m, k = x.shape
    n = w.shape[1]
    tm, mp = _pick_tm(m, k, n, out_bytes=jnp.dtype(out_dtype).itemsize)
    xb = _maybe_pad_rows(x.astype(jnp.bfloat16), mp)
    g2 = gamma.reshape(1, n).astype(jnp.float32)
    b2 = beta.reshape(1, n).astype(jnp.float32)
    in_specs = [
        pl.BlockSpec((tm, k), lambda i: (i, 0)),
        pl.BlockSpec((k, n), lambda i: (0, 0)),
        pl.BlockSpec((1, n), lambda i: (0, 0)),
        pl.BlockSpec((1, n), lambda i: (0, 0)),
    ]
    args = [xb, w.astype(jnp.bfloat16), g2, b2]
    if residual is not None:
        in_specs.append(pl.BlockSpec((tm, n), lambda i: (i, 0)))
        args.append(_maybe_pad_rows(residual.astype(jnp.bfloat16), mp))
    out = pl.pallas_call(
        partial(_mm_ln_kernel, eps=eps, has_residual=residual is not None),
        out_shape=jax.ShapeDtypeStruct((mp, n), out_dtype),
        grid=(mp // tm,),
        in_specs=in_specs,
        out_specs=pl.BlockSpec((tm, n), lambda i: (i, 0)),
        compiler_params=_compiler_params(("parallel",)),
    )(*args)
    return out[:m] if mp != m else out


# ---------------------------------------------------------------------------
# Pallas kernel: flash attention (optionally fused merge + LayerNorm + residual)
# ---------------------------------------------------------------------------

def _flash_attn_kernel(*refs, scale, lk, tk, fuse_proj, fuse_ln, has_res,
                       approx_recip, ln_eps):
    q_ref, k_ref, v_ref = refs[0], refs[1], refs[2]
    idx = 3
    w_ref = g_ref = b_ref = r_ref = None
    if fuse_proj:
        w_ref = refs[idx]; idx += 1
    if fuse_ln:
        g_ref, b_ref = refs[idx], refs[idx + 1]; idx += 2
    if has_res:
        r_ref = refs[idx]; idx += 1
    o_ref = refs[idx]
    m_sc, l_sc, acc_sc = refs[idx + 1], refs[idx + 2], refs[idx + 3]

    ki = pl.program_id(2)

    @pl.when(ki == 0)
    def _():
        m_sc[...] = jnp.full_like(m_sc, -1e30)
        l_sc[...] = jnp.zeros_like(l_sc)
        acc_sc[...] = jnp.zeros_like(acc_sc)

    q = q_ref[0]
    k = k_ref[0]
    v = v_ref[0]
    s = jax.lax.dot_general(q, k, (((1,), (1,)), ((), ())),
                            preferred_element_type=jnp.float32) * scale
    if lk % tk != 0:
        # mask keys that fall in the padded tail of the (L -> tile multiple) pad
        col = jax.lax.broadcasted_iota(jnp.int32, (1, tk), 1) + ki * tk
        s = jnp.where(col < lk, s, -1e30)

    m_prev = m_sc[...]
    m_new = jnp.maximum(m_prev, jnp.max(s, axis=-1, keepdims=True))
    alpha = jnp.exp(m_prev - m_new)
    p = jnp.exp(s - m_new)
    l_sc[...] = alpha * l_sc[...] + jnp.sum(p, axis=-1, keepdims=True)
    acc_sc[...] = alpha * acc_sc[...] + jnp.dot(
        p.astype(v.dtype), v, preferred_element_type=jnp.float32)
    m_sc[...] = m_new

    @pl.when(ki == pl.num_programs(2) - 1)
    def _():
        inv_l = pl.reciprocal(l_sc[...], approx=approx_recip)
        out = acc_sc[...] * inv_l
        if fuse_proj:
            out = jnp.dot(out.astype(jnp.bfloat16), w_ref[...],
                          preferred_element_type=jnp.float32)
        if fuse_ln:
            mu = jnp.mean(out, axis=-1, keepdims=True)
            var = jnp.mean(jnp.square(out - mu), axis=-1, keepdims=True)
            out = (out - mu) * jax.lax.rsqrt(var + ln_eps)
            out = out * g_ref[...] + b_ref[...]
        if has_res:
            out = out + r_ref[0].astype(jnp.float32)
        o_ref[0] = out.astype(o_ref.dtype)


def attention_pallas(q, k, v, scale, *, proj_w=None, ln_g=None, ln_b=None,
                     residual=None, approx_recip=True, ln_eps=1e-5,
                     out_dtype=jnp.bfloat16):
    """softmax(q k^T * scale) v, flash-tiled over (batch, q tiles, kv tiles).

    Optionally fuses an output projection + LayerNorm (+ residual) into the
    epilogue (UniMatch's merge/norm1/source-add) so the attention message never
    round-trips HBM. v may have batch 1 (broadcast via index_map)."""
    b, lq, c = q.shape
    lk = k.shape[1]
    vb, _, dv = v.shape
    tq = _attn_tile(lq, _ATTN_TQ_CAP)
    tk = _attn_tile(lk, _ATTN_TK_CAP)
    lqp = _round_up(lq, tq)
    lkp = _round_up(lk, tk)
    qf = q if lqp == lq else jnp.pad(q, ((0, 0), (0, lqp - lq), (0, 0)))
    kf = k if lkp == lk else jnp.pad(k, ((0, 0), (0, lkp - lk), (0, 0)))
    vf = v if lkp == lk else jnp.pad(v, ((0, 0), (0, lkp - lk), (0, 0)))

    fuse_proj = proj_w is not None
    fuse_ln = ln_g is not None
    has_res = residual is not None
    dout = proj_w.shape[-1] if fuse_proj else dv

    v_idx = (lambda bb, qi, ki: (0, ki, 0)) if vb == 1 else \
            (lambda bb, qi, ki: (bb, ki, 0))
    in_specs = [
        pl.BlockSpec((1, tq, c), lambda bb, qi, ki: (bb, qi, 0)),
        pl.BlockSpec((1, tk, c), lambda bb, qi, ki: (bb, ki, 0)),
        pl.BlockSpec((1, tk, dv), v_idx),
    ]
    args = [qf, kf, vf]
    if fuse_proj:
        in_specs.append(pl.BlockSpec((c, dout), lambda bb, qi, ki: (0, 0)))
        args.append(proj_w.astype(jnp.bfloat16))
    if fuse_ln:
        in_specs.append(pl.BlockSpec((1, dout), lambda bb, qi, ki: (0, 0)))
        in_specs.append(pl.BlockSpec((1, dout), lambda bb, qi, ki: (0, 0)))
        args.append(ln_g.reshape(1, dout).astype(jnp.float32))
        args.append(ln_b.reshape(1, dout).astype(jnp.float32))
    if has_res:
        rf = residual if lqp == lq else jnp.pad(
            residual, ((0, 0), (0, lqp - lq), (0, 0)))
        # constant block index across ki -> fetched once per q tile
        in_specs.append(pl.BlockSpec((1, tq, dout), lambda bb, qi, ki: (bb, qi, 0)))
        args.append(rf)

    out = pl.pallas_call(
        partial(_flash_attn_kernel, scale=scale, lk=lk, tk=tk,
                fuse_proj=fuse_proj, fuse_ln=fuse_ln, has_res=has_res,
                approx_recip=approx_recip, ln_eps=ln_eps),
        out_shape=jax.ShapeDtypeStruct((b, lqp, dout), out_dtype),
        grid=(b, lqp // tq, lkp // tk),
        in_specs=in_specs,
        out_specs=pl.BlockSpec((1, tq, dout), lambda bb, qi, ki: (bb, qi, 0)),
        scratch_shapes=[
            pltpu.VMEM((tq, 1), jnp.float32),
            pltpu.VMEM((tq, 1), jnp.float32),
            pltpu.VMEM((tq, dv), jnp.float32),
        ],
        compiler_params=_compiler_params(("parallel", "parallel", "arbitrary")),
    )(*args)
    return out[:, :lq, :] if lqp != lq else out


# ---------------------------------------------------------------------------
# Pallas kernel: conv2d (tap accumulation, row-tiled) / im2col GEMM for tiny cin
# ---------------------------------------------------------------------------

def _conv_tap_kernel(x_ref, w_ref, b_ref, o_ref, *, k, s, ws, trf, act):
    cout = w_ref.shape[-1]
    acc = jnp.zeros((trf, cout), jnp.float32)
    for i in range(k):
        for j in range(k):
            p = (i % s) * s + (j % s)
            off = (i // s) * ws + (j // s)
            win = x_ref[0, 0, p, off:off + trf, :]
            acc = acc + jnp.dot(win, w_ref[i, j],
                                preferred_element_type=jnp.float32)
    acc = acc + b_ref[...]
    if act == "relu":
        acc = jnp.maximum(acc, 0.0)
    o_ref[0, 0] = acc.astype(o_ref.dtype)


def conv2d_pallas(x_nhwc, w, b, k, s, act=None, out_dtype=jnp.bfloat16):
    """'same'-padded conv, stride s, weight [k,k,Cin,Cout].

    * 1x1 and small-cin convs (cin*k*k <= 256) become M-tiled GEMMs (taps packed
      into the contraction -> full MXU depth, full pipelining/megacore).
    * Other convs run a tap-accumulation kernel on a stride-phase-decomposed
      input, row-tiled over output rows with haloed slabs (bounded VMEM)."""
    bsz, h, wdt, cin = x_nhwc.shape
    cout = w.shape[-1]
    bias = (b if b is not None else jnp.zeros((cout,), jnp.float32))

    if k == 1 and s == 1:
        out = linear_pallas(x_nhwc.reshape(-1, cin), w.reshape(cin, cout), bias,
                            act=act, out_dtype=out_dtype)
        return out.reshape(bsz, h, wdt, cout)

    pad = k // 2
    oh = (h + 2 * pad - k) // s + 1
    ow = (wdt + 2 * pad - k) // s + 1

    if cin * k * k <= 256:
        # pack all taps into the contraction (im2col at output resolution)
        xp = jnp.pad(x_nhwc, ((0, 0), (pad, pad), (pad, pad), (0, 0)))
        xp = xp.astype(jnp.bfloat16)
        cols = [jax.lax.slice(xp, (0, i, j, 0),
                              (bsz, i + (oh - 1) * s + 1, j + (ow - 1) * s + 1, cin),
                              (1, s, s, 1))
                for i in range(k) for j in range(k)]
        patches = jnp.concatenate(cols, axis=-1).reshape(bsz * oh * ow, k * k * cin)
        out = linear_pallas(patches, w.reshape(k * k * cin, cout), bias,
                            act=act, out_dtype=out_dtype)
        return out.reshape(bsz, oh, ow, cout)

    xp = jnp.pad(x_nhwc, ((0, 0), (pad, pad), (pad, pad), (0, 0)))
    hp, wp = h + 2 * pad, wdt + 2 * pad
    hp2, wp2 = _round_up(hp, s), _round_up(wp, s)
    xp = jnp.pad(xp, ((0, 0), (0, hp2 - hp), (0, wp2 - wp), (0, 0)))
    hs, ws = hp2 // s, wp2 // s
    # stride-phase decomposition (no k*k im2col expansion in HBM)
    ph = xp.reshape(bsz, hs, s, ws, s, cin).transpose(0, 2, 4, 1, 3, 5)
    ph = ph.reshape(bsz, s * s, hs * ws, cin)

    eh = (k - 1) // s
    max_off = eh * ws + eh
    m2 = oh * ws
    trf = min(_round_up(m2, 8), _CONV_ROW_TILE)
    nt = pl.cdiv(m2, trf)
    m2p = nt * trf
    need_rows = m2p + max_off
    if need_rows > hs * ws:
        ph = jnp.pad(ph, ((0, 0), (0, 0), (0, need_rows - hs * ws), (0, 0)))
    # haloed row-tile slabs: [bsz, nt, s*s, trf+max_off, cin]
    slabs = jnp.stack(
        [ph[:, :, t * trf:t * trf + trf + max_off, :] for t in range(nt)], axis=1)
    slabs = slabs.astype(jnp.bfloat16)
    bias2 = bias.reshape(1, cout).astype(jnp.float32)

    out = pl.pallas_call(
        partial(_conv_tap_kernel, k=k, s=s, ws=ws, trf=trf, act=act),
        out_shape=jax.ShapeDtypeStruct((bsz, nt, trf, cout), out_dtype),
        grid=(bsz, nt),
        in_specs=[
            pl.BlockSpec((1, 1, s * s, trf + max_off, cin),
                         lambda bb, t: (bb, t, 0, 0, 0)),
            pl.BlockSpec((k, k, cin, cout), lambda bb, t: (0, 0, 0, 0)),
            pl.BlockSpec((1, cout), lambda bb, t: (0, 0)),
        ],
        out_specs=pl.BlockSpec((1, 1, trf, cout), lambda bb, t: (bb, t, 0, 0)),
        compiler_params=_compiler_params(("parallel", "parallel")),
    )(slabs, w.astype(jnp.bfloat16), bias2)
    out = out.reshape(bsz, m2p, cout)[:, :m2, :].reshape(bsz, oh, ws, cout)
    return out[:, :, :ow, :]


# ---------------------------------------------------------------------------
# JAX glue (normalization, position embedding, convex upsampling, orchestration)
# ---------------------------------------------------------------------------

def normalize_img(img0, img1):
    mean = jnp.array([0.485, 0.456, 0.406], jnp.float32).reshape(1, 3, 1, 1)
    std = jnp.array([0.229, 0.224, 0.225], jnp.float32).reshape(1, 3, 1, 1)
    return (img0 / 255.0 - mean) / std, (img1 / 255.0 - mean) / std


def backbone_forward(x_nhwc, backbone_params):
    # TODO(synk): CNNEncoder's ResNet residual blocks + InstanceNorm are simplified
    # to a plain 4-conv stride-8 encoder with the same output stride and channels.
    for layer in backbone_params:
        x_nhwc = conv2d_pallas(x_nhwc, layer["w"], layer["b"], layer["k"],
                               layer["s"], act=layer["act"])
    return x_nhwc


def position_embedding_sine(h, w, c, temperature=10000.0):
    num_pos_feats = c // 2
    scale = 2.0 * math.pi
    eps = 1e-6
    y_embed = jnp.broadcast_to(jnp.arange(1, h + 1, dtype=jnp.float32)[:, None], (h, w))
    x_embed = jnp.broadcast_to(jnp.arange(1, w + 1, dtype=jnp.float32)[None, :], (h, w))
    y_embed = y_embed / (y_embed[-1:, :] + eps) * scale
    x_embed = x_embed / (x_embed[:, -1:] + eps) * scale
    dim_t = jnp.arange(num_pos_feats, dtype=jnp.float32)
    dim_t = temperature ** (2.0 * jnp.floor(dim_t / 2.0) / num_pos_feats)
    pos_x = x_embed[:, :, None] / dim_t
    pos_y = y_embed[:, :, None] / dim_t
    pos_x = jnp.stack([jnp.sin(pos_x[:, :, 0::2]), jnp.cos(pos_x[:, :, 1::2])],
                      axis=3).reshape(h, w, num_pos_feats)
    pos_y = jnp.stack([jnp.sin(pos_y[:, :, 0::2]), jnp.cos(pos_y[:, :, 1::2])],
                      axis=3).reshape(h, w, num_pos_feats)
    return jnp.concatenate([pos_y, pos_x], axis=-1)  # [h, w, c]


def transformer_layer(source, target, p, self_attn, with_ffn):
    bsz, l, c = source.shape
    src2d = source.reshape(-1, c)
    if self_attn:
        q, k, v = linear_multi_pallas(src2d, p["qkv_w"], splits=(c, c, c))
        q = q.reshape(bsz, l, c)
        k = k.reshape(bsz, l, c)
        v = v.reshape(bsz, l, c)
    else:
        q = linear_pallas(src2d, p["q_w"]).reshape(bsz, l, c)
        k, v = linear_multi_pallas(target.reshape(-1, c), p["kv_w"], splits=(c, c))
        k = k.reshape(bsz, l, c)
        v = v.reshape(bsz, l, c)
    scale = 1.0 / math.sqrt(c)
    if not with_ffn:
        # out = source + norm1(merge(attn))  -- fully fused into the epilogue
        return attention_pallas(q, k, v, scale, proj_w=p["merge_w"],
                                ln_g=p["norm1_g"], ln_b=p["norm1_b"],
                                residual=source)
    msg = attention_pallas(q, k, v, scale, proj_w=p["merge_w"],
                           ln_g=p["norm1_g"], ln_b=p["norm1_b"])
    cat = jnp.concatenate([src2d, msg.reshape(-1, c)], axis=-1)
    hidden = linear_pallas(cat, p["mlp_w1"], act="gelu")
    out = mm_ln_pallas(hidden, p["mlp_w2"], p["norm2_g"], p["norm2_b"],
                       residual=src2d)
    return out.reshape(bsz, l, c)


def transformer_block(source, target, p):
    source = transformer_layer(source, source, p["self_attn"],
                               self_attn=True, with_ffn=False)
    source = transformer_layer(source, target, p["cross_attn_ffn"],
                               self_attn=False, with_ffn=True)
    return source


def feature_transformer(f0_tok, f1_tok, layers_params):
    b = f0_tok.shape[0]
    concat0 = jnp.concatenate([f0_tok, f1_tok], axis=0)
    concat1 = jnp.concatenate([f1_tok, f0_tok], axis=0)
    for p in layers_params:
        concat0 = transformer_block(concat0, concat1, p)
        concat1 = jnp.concatenate([concat0[b:], concat0[:b]], axis=0)
    return concat0[:b], concat0[b:]


def global_correlation_softmax_pallas(f0_tok, f1_tok, gpad, coords_exact_bf16):
    """Global correlation softmax -> soft-argmax correspondence; flow kept
    lane-dense as [B, L, 128] (x, y in lanes 0/1). V is the [1, L, 128]
    coordinate table, broadcast over batch via index_map (never materialized
    per-batch in HBM). Exact softmax normalization (flow-producing path)."""
    b, l, c = f0_tok.shape
    scale = 1.0 / math.sqrt(c)
    v_dtype = jnp.bfloat16 if coords_exact_bf16 else jnp.float32
    v = gpad[None].astype(v_dtype)                       # [1, L, 128]
    corresp = attention_pallas(f0_tok, f1_tok, v, scale,
                               approx_recip=False, out_dtype=jnp.float32)
    return corresp - gpad[None]


def self_attn_propagation(feat_tok, flow_pad, p):
    b, l, c = feat_tok.shape
    q = linear_pallas(feat_tok.reshape(-1, c), p["q_w"], p["q_b"]).reshape(b, l, c)
    k = linear_pallas(feat_tok.reshape(-1, c), p["k_w"], p["k_b"]).reshape(b, l, c)
    # V (flow) stays f32 end-to-end; exact softmax normalization.
    return attention_pallas(q, k, flow_pad, 1.0 / math.sqrt(c),
                            approx_recip=False, out_dtype=jnp.float32)


def upsample_flow_with_mask(flow_nchw, mask_nchw, uf):
    # TODO(synk): convex-upsampling mask softmax/blend kept in plain JAX glue
    # (tiny 9-wide reduction); the mask-producing convs run in Pallas.
    b, fc, h, w = flow_nchw.shape
    mask = mask_nchw.reshape(b, 1, 9, uf, uf, h, w)
    mask = jax.nn.softmax(mask, axis=2)
    fp = jnp.pad(uf * flow_nchw, ((0, 0), (0, 0), (1, 1), (1, 1)))
    neigh = jnp.stack([fp[:, :, dy:dy + h, dx:dx + w]
                       for dy in range(3) for dx in range(3)], axis=2)
    up = jnp.sum(mask * neigh.reshape(b, fc, 9, 1, 1, h, w), axis=2)
    up = jnp.transpose(up, (0, 1, 4, 2, 5, 3)).reshape(b, fc, h * uf, w * uf)
    return up


# ---------------------------------------------------------------------------
# Deterministic parameter initialization (synthetic, not a checkpoint)
# ---------------------------------------------------------------------------

def init_params(key, c=128, num_layers=6, ffn_expansion=4, upsample_factor=8):
    counter = [0]

    def nk():
        counter[0] += 1
        return jax.random.fold_in(key, counter[0])

    def wgt(shape, scale=0.05):
        return (scale * jax.random.normal(nk(), shape, jnp.float32)).astype(jnp.bfloat16)

    params = {}

    backbone = []
    specs = [(7, 2, 3, 32, "relu"), (3, 2, 32, 64, "relu"),
             (3, 2, 64, 96, "relu"), (1, 1, 96, c, None)]
    for k_, s_, cin, cout, act in specs:
        backbone.append({
            "k": k_, "s": s_, "act": act,
            "w": wgt((k_, k_, cin, cout)),
            "b": jnp.zeros((cout,), jnp.float32),
        })
    params["backbone"] = backbone

    def self_attn_params():
        return {
            "qkv_w": wgt((c, 3 * c)),
            "merge_w": wgt((c, c)),
            "norm1_g": jnp.ones((c,), jnp.float32),
            "norm1_b": jnp.zeros((c,), jnp.float32),
        }

    def cross_attn_ffn_params():
        hidden = 2 * c * ffn_expansion
        return {
            "q_w": wgt((c, c)),
            "kv_w": wgt((c, 2 * c)),
            "merge_w": wgt((c, c)),
            "norm1_g": jnp.ones((c,), jnp.float32),
            "norm1_b": jnp.zeros((c,), jnp.float32),
            "mlp_w1": wgt((2 * c, hidden)),
            "mlp_w2": wgt((hidden, c)),
            "norm2_g": jnp.ones((c,), jnp.float32),
            "norm2_b": jnp.zeros((c,), jnp.float32),
        }

    params["transformer"] = [
        {"self_attn": self_attn_params(), "cross_attn_ffn": cross_attn_ffn_params()}
        for _ in range(num_layers)
    ]

    params["prop"] = {
        "q_w": wgt((c, c)), "q_b": jnp.zeros((c,), jnp.float32),
        "k_w": wgt((c, c)), "k_b": jnp.zeros((c,), jnp.float32),
    }

    params["upsampler"] = {
        "w1": wgt((3, 3, 2 + c, 256)),
        "b1": jnp.zeros((256,), jnp.float32),
        "w2": wgt((256, upsample_factor ** 2 * 9)),
        "b2": jnp.zeros((upsample_factor ** 2 * 9,), jnp.float32),
    }
    return params


# ---------------------------------------------------------------------------
# UniMatch forward (flow task, single scale, global correlation, no refinement)
# ---------------------------------------------------------------------------

def unimatch_forward(params, img0, img1, upsample_factor=8):
    img0, img1 = normalize_img(img0, img1)
    b = img0.shape[0]

    # extract_feature: concat over batch, run backbone, split back
    x = jnp.concatenate([img0, img1], axis=0).transpose(0, 2, 3, 1)
    feat = backbone_forward(x.astype(jnp.bfloat16), params["backbone"])  # [2b,h,w,C]
    _, h, w, c = feat.shape

    # feature_add_position (attn_splits == 1 -> global sine embedding)
    pos = position_embedding_sine(h, w, c)
    feat = (feat.astype(jnp.float32) + pos[None]).astype(jnp.bfloat16)
    feature0, feature1 = feat[:b], feat[b:]

    f0_tok = feature0.reshape(b, h * w, c)
    f1_tok = feature1.reshape(b, h * w, c)
    f0_tok, f1_tok = feature_transformer(f0_tok, f1_tok, params["transformer"])

    # global_correlation_softmax (corr_radius == -1); flow carried lane-dense
    # as [B, L, 128] with (x, y) in lanes 0/1, remaining lanes zero.
    ys, xs = jnp.meshgrid(jnp.arange(h, dtype=jnp.float32),
                          jnp.arange(w, dtype=jnp.float32), indexing="ij")
    grid_xy = jnp.stack([xs, ys], axis=-1).reshape(h * w, 2)
    gpad = jnp.pad(grid_xy, ((0, 0), (0, 126)))
    coords_exact_bf16 = max(h, w) <= 256  # integer coords exact in bf16
    flow_pad = global_correlation_softmax_pallas(f0_tok, f1_tok, gpad,
                                                 coords_exact_bf16)

    # SelfAttnPropagation (prop_radius == -1 -> global flow propagation)
    flow_pad = self_attn_propagation(f0_tok, flow_pad, params["prop"])
    flow_nhwc = flow_pad[..., :2].reshape(b, h, w, 2)
    feat_nhwc = f0_tok.reshape(b, h, w, c)

    # upsampler: Conv3x3(2+C -> 256) + ReLU + Conv1x1(256 -> uf^2 * 9)
    concat = jnp.concatenate([flow_nhwc.astype(jnp.bfloat16), feat_nhwc], axis=-1)
    hidden = conv2d_pallas(concat, params["upsampler"]["w1"],
                           params["upsampler"]["b1"], k=3, s=1, act="relu")
    mask = linear_pallas(hidden.reshape(-1, hidden.shape[-1]),
                         params["upsampler"]["w2"], params["upsampler"]["b2"],
                         out_dtype=jnp.float32)
    mask = mask.reshape(b, h, w, -1)

    flow_nchw = jnp.transpose(flow_nhwc, (0, 3, 1, 2))
    mask_nchw = jnp.transpose(mask, (0, 3, 1, 2))
    flow_up = upsample_flow_with_mask(flow_nchw, mask_nchw, upsample_factor)
    return {"flow_preds": [flow_up]}


if __name__ == "__main__":
    key = jax.random.PRNGKey(0)
    pkey, ikey0, ikey1 = jax.random.split(key, 3)

    C = 128
    UF = 8
    params = init_params(pkey, c=C, num_layers=6, ffn_expansion=4, upsample_factor=UF)

    # Small inputs: batch=1, 3x32x32 images -> 4x4 features at 1/8 scale.
    img0 = jax.random.uniform(ikey0, (1, 3, 32, 32), jnp.float32, 0.0, 255.0)
    img1 = jax.random.uniform(ikey1, (1, 3, 32, 32), jnp.float32, 0.0, 255.0)

    out = unimatch_forward(params, img0, img1, upsample_factor=UF)
    flow_up = out["flow_preds"][-1]
    jax.block_until_ready(flow_up)
    assert flow_up.shape == (1, 2, 32, 32), flow_up.shape
    assert bool(jnp.all(jnp.isfinite(flow_up)))
    print("KERNEL_OK")
</pallas_src>

<mosaic_0001>
module attributes {stable_mosaic.version = 11 : i64} {
  func.func @_mm_bias_act_kernel(%arg0: i32, %arg1: memref<512x147xbf16, #tpu.memory_space<vmem>>, %arg2: memref<147x32xbf16, #tpu.memory_space<vmem>>, %arg3: memref<1x32xf32, #tpu.memory_space<vmem>>, %arg4: memref<512x32xbf16, #tpu.memory_space<vmem>>) attributes {dimension_semantics = [#tpu.dimension_semantics<parallel>], iteration_bounds = array<i64: 1>, scalar_prefetch = 0 : i64, scratch_operands = 0 : i64, tpu.core_type = #tpu.core_type<tc>, window_params = [{transform_indices = @transform_0, window_bounds = array<i64: 512, 147>}, {pipeline_mode = #tpu.pipeline_mode<synchronous>, transform_indices = @transform_1, window_bounds = array<i64: 147, 32>}, {pipeline_mode = #tpu.pipeline_mode<synchronous>, transform_indices = @transform_2, window_bounds = array<i64: 1, 32>}, {transform_indices = @transform_3, window_bounds = array<i64: 512, 32>}]} {
    %c0 = arith.constant 0 : index
    %c0_0 = arith.constant 0 : index
    %0 = vector.load %arg1[%c0, %c0_0] : memref<512x147xbf16, #tpu.memory_space<vmem>>, vector<512x147xbf16>
    %c0_1 = arith.constant 0 : index
    %c0_2 = arith.constant 0 : index
    %1 = vector.load %arg2[%c0_1, %c0_2] : memref<147x32xbf16, #tpu.memory_space<vmem>>, vector<147x32xbf16>
    %cst = arith.constant dense<0.000000e+00> : vector<512x32xf32>
    %2 = tpu.matmul %0, %1, %cst {dimension_numbers = #tpu.dot_dimension_numbers<[1], [0], [0], [1], [0, 0, 1, 1], [], []>} : vector<512x147xbf16>, vector<147x32xbf16>, vector<512x32xf32> -> vector<512x32xf32>
    %c0_3 = arith.constant 0 : index
    %c0_4 = arith.constant 0 : index
    %3 = vector.load %arg3[%c0_3, %c0_4] : memref<1x32xf32, #tpu.memory_space<vmem>>, vector<1x32xf32>
    %4 = vector.broadcast %3 : vector<1x32xf32> to vector<512x32xf32>
    %5 = arith.addf %2, %4 : vector<512x32xf32>
    %cst_5 = arith.constant 0.000000e+00 : f32
    %6 = vector.broadcast %cst_5 : f32 to vector<512x32xf32>
    %7 = arith.maximumf %5, %6 : vector<512x32xf32>
    %8 = arith.truncf %7 : vector<512x32xf32> to vector<512x32xbf16>
    %c0_6 = arith.constant 0 : index
    %c0_7 = arith.constant 0 : index
    %9 = vector.load %arg4[%c0_6, %c0_7] : memref<512x32xbf16, #tpu.memory_space<vmem>>, vector<512x32xbf16>
    tpu.vector_store %arg4[%c0_6, %c0_7], %8 {strides = array<i32>} : memref<512x32xbf16, #tpu.memory_space<vmem>>, vector<512x32xbf16>,
    return
  }
  func.func @transform_0(%arg0: i32) -> (i32, i32) {
    %c0_i32 = arith.constant 0 : i32
    %c0_i32_0 = arith.constant 0 : i32
    return %arg0, %c0_i32 : i32, i32
  }
  func.func @transform_1(%arg0: i32) -> (i32, i32) {
    %c0_i32 = arith.constant 0 : i32
    %c0_i32_0 = arith.constant 0 : i32
    %c0_i32_1 = arith.constant 0 : i32
    return %c0_i32, %c0_i32_0 : i32, i32
  }
  func.func @transform_2(%arg0: i32) -> (i32, i32) {
    %c0_i32 = arith.constant 0 : i32
    %c0_i32_0 = arith.constant 0 : i32
    %c0_i32_1 = arith.constant 0 : i32
    return %c0_i32, %c0_i32_0 : i32, i32
  }
  func.func @transform_3(%arg0: i32) -> (i32, i32) {
    %c0_i32 = arith.constant 0 : i32
    %c0_i32_0 = arith.constant 0 : i32
    return %arg0, %c0_i32 : i32, i32
  }
}

</mosaic_0001>

<bundles_post_ra>
// kernel: tpu_custom_call.1
= control target key start
LH: loop header
LB: loop body
LE: loop exit
PB: predicated region body
PF: predicated region fallthrough
CT: control target
= control target key end

     0   :  { %v1595_v0 = vmov 0   ;;  %vm450_vm0 = vcmask 154624   ;;  %vm547_vm1 = vcmask 1040384   ;;  %vm548_vm2 = vcmask 1041408   ;;  %s2196_s1 = inlined_call_operand.vmem [shape: bf16[147,32], index: 1, kind: input, shape index: {}]   ;;  %s2197_s0 = inlined_call_operand.vmem [shape: bf16[512,147], index: 0, kind: input, shape index: {}]   ;;  %s2198_s2 = inlined_call_operand.vmem [shape: f32[1,32], index: 2, kind: input, shape index: {}]   ;;  %s2199_s3 = inlined_call_operand.vmem [shape: bf16[512,32], index: 3, kind: output, shape index: {}]  }
   0x1   :  { %554 = vmatprep.subr.bf16.mxu0 %v1595_v0  ;;  %1467 = vmatprep.subr.bf16.mxu1 %v1595_v0  ;;  %v1489_v1 = vld [vmem:[%s2196_s1] sm:$0xff]   ;;  %v1490_v2 = vld [vmem:[%s2196_s1 + $0x8] sm:$0xff]   ;;  %v1491_v3 = vld [vmem:[%s2196_s1 + $0x10] sm:$0xff]   ;;  %v1596_v11 = vmov 65535   ;;  %vm1163_vm3 = vcmask 257024  }
   0x2   :  { %555 = vmatpush1.bf16.msra.mxu0 %v1489_v1  ;;  %1477 = vmatpush1.bf16.msra.mxu1 %v1489_v1  ;;  %v1492_v4 = vld [vmem:[%s2196_s1 + $0x18] sm:$0xff]   ;;  %v1501_v5 = vld [vmem:[%s2197_s0 + $0x4] ss:$8 sps:$4 sm:$0xff]   ;;  %v1495_v9 = vld [vmem:[%s2196_s1 + $0x30] sm:$0xff]   ;;  %v549_v12 = vsel %vm547_vm1, 4294967295, %v1596_v11 }
   0x3   :  { %556 = vmatprep.subr.bf16.mxu0 %v1595_v0  ;;  %1468 = vmatprep.subr.bf16.mxu1 %v1595_v0  ;;  %v1504_v6 = vld [vmem:[%s2197_s0 + $0x104] ss:$8 sps:$4 sm:$0xff]   ;;  %v1496_v10 = vld [vmem:[%s2196_s1 + $0x38] sm:$0xff]   ;;  %v1498_v14 = vld [vmem:[%s2196_s1 + $0x48] ss:$0 sps:$4 sm:$0x33]  }
   0x4   :  { %1307 = vmatprep.mubr.msk.bf16.mxu0 %vm450_vm0, %v1501_v5  ;;  %v1493_v7 = vld [vmem:[%s2196_s1 + $0x20] sm:$0xff]   ;;  %1323 = vmatprep.mubr.msk.bf16.mxu1 %vm450_vm0, %v1504_v6  ;;  %v1494_v8 = vld [vmem:[%s2196_s1 + $0x28] sm:$0xff]   ;;  %v550_v15 = vsel %vm548_vm2, %v549_v12, 0  ;;  %v1505_v19 = vld [vmem:[%s2197_s0 + $0x14] ss:$8 sps:$4 sm:$0xff]  }
   0x5   :  { %v1497_v13 = vld [vmem:[%s2196_s1 + $0x40] sm:$0xff]   ;;  %v552_v16 = vand.u32 %v1498_v14, %v550_v15  ;;  %v1507_v20 = vld [vmem:[%s2197_s0 + $0x114] ss:$8 sps:$4 sm:$0xff]   ;;  %v1509_v21 = vld [vmem:[%s2197_s0 + $0x10] ss:$8 sps:$4 sm:$0xff]  }
   0x6   :  { %557 = vmatpush1.bf16.msra.mxu0 %v1490_v2  ;;  %1478 = vmatpush1.bf16.msra.mxu1 %v1490_v2  ;;  %v1499_v17 = vld [vmem:[%s2197_s0] ss:$8 sps:$4 sm:$0xff]   ;;  %v1510_v22 = vld [vmem:[%s2197_s0 + $0x110] ss:$8 sps:$4 sm:$0xff]   ;;  %v1511_v23 = vld [vmem:[%s2197_s0 + $0x24] ss:$8 sps:$4 sm:$0xff]  }
   0x7   :  { %558 = vmatprep.subr.bf16.mxu0 %v1595_v0  ;;  %1469 = vmatprep.subr.bf16.mxu1 %v1595_v0  ;;  %v1502_v18 = vld [vmem:[%s2197_s0 + $0x100] ss:$8 sps:$4 sm:$0xff]   ;;  %v1513_v24 = vld [vmem:[%s2197_s0 + $0x124] ss:$8 sps:$4 sm:$0xff]   ;;  %v1517_v27 = vld [vmem:[%s2197_s0 + $0x34] ss:$8 sps:$4 sm:$0xff]  }
   0x8   :  { %v1515_v25 = vld [vmem:[%s2197_s0 + $0x20] ss:$8 sps:$4 sm:$0xff]   ;;  %v1519_v28 = vld [vmem:[%s2197_s0 + $0x134] ss:$8 sps:$4 sm:$0xff]   ;;  %v1521_v29 = vld [vmem:[%s2197_s0 + $0x30] ss:$8 sps:$4 sm:$0xff]  }
   0x9   :  { %v1516_v26 = vld [vmem:[%s2197_s0 + $0x120] ss:$8 sps:$4 sm:$0xff]   ;;  %v1522_v30 = vld [vmem:[%s2197_s0 + $0x130] ss:$8 sps:$4 sm:$0xff]   ;;  %v1523_v31 = vld [vmem:[%s2197_s0 + $0x44] ss:$8 sps:$4 sm:$0xff]  }
   0xa   :  { %559 = vmatpush1.bf16.msra.mxu0 %v1491_v3  ;;  %1479 = vmatpush1.bf16.msra.mxu1 %v1491_v3  ;;  %v1525_v32 = vld [vmem:[%s2197_s0 + $0x144] ss:$8 sps:$4 sm:$0xff]   ;;  %v1527_v33 = vld [vmem:[%s2197_s0 + $0x40] ss:$8 sps:$4 sm:$0xff]   ;;  %v1529_v35 = vld [vmem:[%s2197_s0 + $0x54] ss:$8 sps:$4 sm:$0xff]  }
   0xb   :  { %560 = vmatprep.subr.bf16.mxu0 %v1595_v0  ;;  %1470 = vmatprep.subr.bf16.mxu1 %v1595_v0  ;;  %v1528_v34 = vld [vmem:[%s2197_s0 + $0x140] ss:$8 sps:$4 sm:$0xff]   ;;  %v1531_v36 = vld [vmem:[%s2197_s0 + $0x154] ss:$8 sps:$4 sm:$0xff]   ;;  %v1533_v37 = vld [vmem:[%s2197_s0 + $0x50] ss:$8 sps:$4 sm:$0xff]  }
   0xc   :  { %v1534_v38 = vld [vmem:[%s2197_s0 + $0x150] ss:$8 sps:$4 sm:$0xff]   ;;  %v1535_v39 = vld [vmem:[%s2197_s0 + $0x64] ss:$8 sps:$4 sm:$0xff]   ;;  %v1539_v41 = vld [vmem:[%s2197_s0 + $0x60] ss:$8 sps:$4 sm:$0xff]  }
   0xd   :  { %v1537_v40 = vld [vmem:[%s2197_s0 + $0x164] ss:$8 sps:$4 sm:$0xff]   ;;  %v1540_v42 = vld [vmem:[%s2197_s0 + $0x160] ss:$8 sps:$4 sm:$0xff]   ;;  %v1541_v43 = vld [vmem:[%s2197_s0 + $0x74] ss:$8 sps:$4 sm:$0xff]  }
   0xe   :  { %561 = vmatpush1.bf16.msra.mxu0 %v1492_v4  ;;  %1480 = vmatpush1.bf16.msra.mxu1 %v1492_v4  ;;  %v1543_v44 = vld [vmem:[%s2197_s0 + $0x174] ss:$8 sps:$4 sm:$0xff]   ;;  %v1545_v45 = vld [vmem:[%s2197_s0 + $0x70] ss:$8 sps:$4 sm:$0xff]   ;;  %v1547_v47 = vld [vmem:[%s2197_s0 + $0x84] ss:$8 sps:$4 sm:$0xff]  }
   0xf   :  { %562 = vmatprep.subr.bf16.mxu0 %v1595_v0  ;;  %1471 = vmatprep.subr.bf16.mxu1 %v1595_v0  ;;  %v1546_v46 = vld [vmem:[%s2197_s0 + $0x170] ss:$8 sps:$4 sm:$0xff]   ;;  %v1549_v48 = vld [vmem:[%s2197_s0 + $0x184] ss:$8 sps:$4 sm:$0xff]   ;;  %v1551_v49 = vld [vmem:[%s2197_s0 + $0x80] ss:$8 sps:$4 sm:$0xff]  }
  0x10   :  { %v1552_v50 = vld [vmem:[%s2197_s0 + $0x180] ss:$8 sps:$4 sm:$0xff]   ;;  %v1553_v51 = vld [vmem:[%s2197_s0 + $0x94] ss:$8 sps:$4 sm:$0xff]   ;;  %v1557_v53 = vld [vmem:[%s2197_s0 + $0x90] ss:$8 sps:$4 sm:$0xff]  }
  0x11   :  { %v1555_v52 = vld [vmem:[%s2197_s0 + $0x194] ss:$8 sps:$4 sm:$0xff]   ;;  %v1558_v54 = vld [vmem:[%s2197_s0 + $0x190] ss:$8 sps:$4 sm:$0xff]   ;;  %v1559_v55 = vld [vmem:[%s2197_s0 + $0xa4] ss:$8 sps:$4 sm:$0xff]  }
  0x12   :  { %563 = vmatpush1.bf16.msra.mxu0 %v1493_v7  ;;  %1481 = vmatpush1.bf16.msra.mxu1 %v1493_v7  ;;  %v1561_v56 = vld [vmem:[%s2197_s0 + $0x1a4] ss:$8 sps:$4 sm:$0xff]   ;;  %v1563_v57 = vld [vmem:[%s2197_s0 + $0xa0] ss:$8 sps:$4 sm:$0xff]   ;;  %v1565_v59 = vld [vmem:[%s2197_s0 + $0xb4] ss:$8 sps:$4 sm:$0xff]  }
  0x13   :  { %564 = vmatprep.subr.bf16.mxu0 %v1595_v0  ;;  %1472 = vmatprep.subr.bf16.mxu1 %v1595_v0  ;;  %v1564_v58 = vld [vmem:[%s2197_s0 + $0x1a0] ss:$8 sps:$4 sm:$0xff]   ;;  %v1567_v60 = vld [vmem:[%s2197_s0 + $0x1b4] ss:$8 sps:$4 sm:$0xff]   ;;  %v1569_v61 = vld [vmem:[%s2197_s0 + $0xb0] ss:$8 sps:$4 sm:$0xff]  }
  0x14   :  { %v1570_v62 = vld [vmem:[%s2197_s0 + $0x1b0] ss:$8 sps:$4 sm:$0xff]   ;;  %v1571_v63 = vld [vmem:[%s2197_s0 + $0xc4] ss:$8 sps:$4 sm:$0xff]   ;;  %v1575_v1 = vld [vmem:[%s2197_s0 + $0xc0] ss:$8 sps:$4 sm:$0xff]  }
  0x15   :  { %v1576_v2 = vld [vmem:[%s2197_s0 + $0x1c0] ss:$8 sps:$4 sm:$0xff]   ;;  %v1577_v3 = vld [vmem:[%s2197_s0 + $0xd4] ss:$8 sps:$4 sm:$0xff]   ;;  %v1581_v5 = vld [vmem:[%s2197_s0 + $0xd0] ss:$8 sps:$4 sm:$0xff]  }
  0x16   :  { %565 = vmatpush1.bf16.msra.mxu0 %v1494_v8  ;;  %1482 = vmatpush1.bf16.msra.mxu1 %v1494_v8  ;;  %v1579_v4 = vld [vmem:[%s2197_s0 + $0x1d4] ss:$8 sps:$4 sm:$0xff]   ;;  %v1582_v6 = vld [vmem:[%s2197_s0 + $0x1d0] ss:$8 sps:$4 sm:$0xff]   ;;  %v1583_v7 = vld [vmem:[%s2197_s0 + $0xe4] ss:$8 sps:$4 sm:$0xff]  }
  0x17   :  { %566 = vmatprep.subr.bf16.mxu0 %v1595_v0  ;;  %1473 = vmatprep.subr.bf16.mxu1 %v1595_v0  ;;  %v1585_v8 = vld [vmem:[%s2197_s0 + $0x1e4] ss:$8 sps:$4 sm:$0xff]   ;;  %v1589_v11 = vld [vmem:[%s2197_s0 + $0xf4] ss:$8 sps:$4 sm:$0xff]   ;;  %v1594_v14 = vld [vmem:[%s2197_s0 + $0x1f0] ss:$8 sps:$4 sm:$0xff]  }
  0x18   :  { %v1591_v12 = vld [vmem:[%s2197_s0 + $0x1f4] ss:$8 sps:$4 sm:$0xff]   ;;  %v1874_v15 = vld [vmem:[%s2198_s2] ss:$0 sm:$0xff] }
  0x1a   :  { %567 = vmatpush1.bf16.msra.mxu0 %v1495_v9  ;;  %1483 = vmatpush1.bf16.msra.mxu1 %v1495_v9  ;;  %v1587_v9 = vld [vmem:[%s2197_s0 + $0xe0] ss:$8 sps:$4 sm:$0xff]  }
  0x1b   :  { %568 = vmatprep.subr.bf16.mxu0 %v1595_v0  ;;  %1474 = vmatprep.subr.bf16.mxu1 %v1595_v0 }
  0x1e   :  { %569 = vmatpush1.bf16.msra.mxu0 %v1496_v10  ;;  %1484 = vmatpush1.bf16.msra.mxu1 %v1496_v10  ;;  %v1588_v10 = vld [vmem:[%s2197_s0 + $0x1e0] ss:$8 sps:$4 sm:$0xff]  }
  0x1f   :  { %570 = vmatprep.subr.bf16.mxu0 %v1595_v0  ;;  %1475 = vmatprep.subr.bf16.mxu1 %v1595_v0 }
  0x22   :  { %571 = vmatpush1.bf16.msra.mxu0 %v1497_v13  ;;  %1485 = vmatpush1.bf16.msra.mxu1 %v1497_v13  ;;  %v1593_v13 = vld [vmem:[%s2197_s0 + $0xf0] ss:$8 sps:$4 sm:$0xff]  }
  0x23   :  { %572 = vmatprep.subr.bf16.mxu0 %v1595_v0  ;;  %1476 = vmatprep.subr.bf16.mxu1 %v1595_v0  ;;  %v1573_v0 = vld [vmem:[%s2197_s0 + $0x1c4] ss:$8 sps:$4 sm:$0xff]  }
  0x26   :  { %573 = vmatpush1.bf16.msra.mxu0 %v552_v16  ;;  %1486 = vmatpush1.bf16.msra.mxu1 %v552_v16 }
  0x29   :  { %587 = vmatmul.mubr.bf16.vlgmr.msra.gmra.mrb[0].mxu0 %v1499_v17  ;;  %715 = vmatmul.mubr.bf16.vlgmr.msra.gmra.mrb[0].mxu1 %v1502_v18 }
  0x2a   :  { %1308 = vmatprep.mubr.msk.bf16.mxu0 %vm450_vm0, %v1505_v19  ;;  %1324 = vmatprep.mubr.msk.bf16.mxu1 %vm450_vm0, %v1507_v20 }
  0x31   :  { %595 = vmatmul.mubr.bf16.gmra.mrb[4].mxu0 %v1509_v21  ;;  %723 = vmatmul.mubr.bf16.gmra.mrb[4].mxu1 %v1510_v22 }
  0x32   :  { %1309 = vmatprep.mubr.msk.bf16.mxu0 %vm450_vm0, %v1511_v23  ;;  %1325 = vmatprep.mubr.msk.bf16.mxu1 %vm450_vm0, %v1513_v24 }
  0x39   :  { %603 = vmatmul.mubr.bf16.gmra.mrb[8].mxu0 %v1515_v25  ;;  %731 = vmatmul.mubr.bf16.gmra.mrb[8].mxu1 %v1516_v26 }
  0x3a   :  { %1310 = vmatprep.mubr.msk.bf16.mxu0 %vm450_vm0, %v1517_v27  ;;  %1326 = vmatprep.mubr.msk.bf16.mxu1 %vm450_vm0, %v1519_v28 }
  0x41   :  { %611 = vmatmul.mubr.bf16.gmra.mrb[12].mxu0 %v1521_v29  ;;  %739 = vmatmul.mubr.bf16.gmra.mrb[12].mxu1 %v1522_v30 }
  0x42   :  { %1311 = vmatprep.mubr.msk.bf16.mxu0 %vm450_vm0, %v1523_v31  ;;  %1327 = vmatprep.mubr.msk.bf16.mxu1 %vm450_vm0, %v1525_v32 }
  0x49   :  { %619 = vmatmul.mubr.bf16.gmra.mrb[16].mxu0 %v1527_v33  ;;  %747 = vmatmul.mubr.bf16.gmra.mrb[16].mxu1 %v1528_v34 }
  0x4a   :  { %1312 = vmatprep.mubr.msk.bf16.mxu0 %vm450_vm0, %v1529_v35  ;;  %1328 = vmatprep.mubr.msk.bf16.mxu1 %vm450_vm0, %v1531_v36 }
  0x51   :  { %627 = vmatmul.mubr.bf16.gmra.mrb[20].mxu0 %v1533_v37  ;;  %755 = vmatmul.mubr.bf16.gmra.mrb[20].mxu1 %v1534_v38 }
  0x52   :  { %1313 = vmatprep.mubr.msk.bf16.mxu0 %vm450_vm0, %v1535_v39  ;;  %1329 = vmatprep.mubr.msk.bf16.mxu1 %vm450_vm0, %v1537_v40 }
  0x59   :  { %635 = vmatmul.mubr.bf16.gmra.mrb[24].mxu0 %v1539_v41  ;;  %763 = vmatmul.mubr.bf16.gmra.mrb[24].mxu1 %v1540_v42 }
  0x5a   :  { %1314 = vmatprep.mubr.msk.bf16.mxu0 %vm450_vm0, %v1541_v43  ;;  %1330 = vmatprep.mubr.msk.bf16.mxu1 %vm450_vm0, %v1543_v44 }
  0x61   :  { %643 = vmatmul.mubr.bf16.gmra.mrb[28].mxu0 %v1545_v45  ;;  %771 = vmatmul.mubr.bf16.gmra.mrb[28].mxu1 %v1546_v46 }
  0x62   :  { %1315 = vmatprep.mubr.msk.bf16.mxu0 %vm450_vm0, %v1547_v47  ;;  %1331 = vmatprep.mubr.msk.bf16.mxu1 %vm450_vm0, %v1549_v48 }
  0x69   :  { %651 = vmatmul.mubr.bf16.gmra.mrb[32].mxu0 %v1551_v49  ;;  %779 = vmatmul.mubr.bf16.gmra.mrb[32].mxu1 %v1552_v50 }
  0x6a   :  { %1316 = vmatprep.mubr.msk.bf16.mxu0 %vm450_vm0, %v1553_v51  ;;  %1332 = vmatprep.mubr.msk.bf16.mxu1 %vm450_vm0, %v1555_v52 }
  0x71   :  { %659 = vmatmul.mubr.bf16.gmra.mrb[36].mxu0 %v1557_v53  ;;  %787 = vmatmul.mubr.bf16.gmra.mrb[36].mxu1 %v1558_v54 }
  0x72   :  { %1317 = vmatprep.mubr.msk.bf16.mxu0 %vm450_vm0, %v1559_v55  ;;  %1333 = vmatprep.mubr.msk.bf16.mxu1 %vm450_vm0, %v1561_v56 }
  0x79   :  { %667 = vmatmul.mubr.bf16.gmra.mrb[40].mxu0 %v1563_v57  ;;  %795 = vmatmul.mubr.bf16.gmra.mrb[40].mxu1 %v1564_v58 }
  0x7a   :  { %1318 = vmatprep.mubr.msk.bf16.mxu0 %vm450_vm0, %v1565_v59  ;;  %1334 = vmatprep.mubr.msk.bf16.mxu1 %vm450_vm0, %v1567_v60 }
  0x81   :  { %675 = vmatmul.mubr.bf16.gmra.mrb[44].mxu0 %v1569_v61  ;;  %803 = vmatmul.mubr.bf16.gmra.mrb[44].mxu1 %v1570_v62 }
  0x82   :  { %1319 = vmatprep.mubr.msk.bf16.mxu0 %vm450_vm0, %v1571_v63  ;;  %1335 = vmatprep.mubr.msk.bf16.mxu1 %vm450_vm0, %v1573_v0 }
  0x89   :  { %683 = vmatmul.mubr.bf16.gmra.mrb[48].mxu0 %v1575_v1  ;;  %811 = vmatmul.mubr.bf16.gmra.mrb[48].mxu1 %v1576_v2 }
  0x8a   :  { %1320 = vmatprep.mubr.msk.bf16.mxu0 %vm450_vm0, %v1577_v3  ;;  %1336 = vmatprep.mubr.msk.bf16.mxu1 %vm450_vm0, %v1579_v4 }
  0x91   :  { %691 = vmatmul.mubr.bf16.gmra.mrb[52].mxu0 %v1581_v5  ;;  %819 = vmatmul.mubr.bf16.gmra.mrb[52].mxu1 %v1582_v6 }
  0x92   :  { %1321 = vmatprep.mubr.msk.bf16.mxu0 %vm450_vm0, %v1583_v7  ;;  %1337 = vmatprep.mubr.msk.bf16.mxu1 %vm450_vm0, %v1585_v8 }
  0x99   :  { %699 = vmatmul.mubr.bf16.gmra.mrb[56].mxu0 %v1587_v9  ;;  %827 = vmatmul.mubr.bf16.gmra.mrb[56].mxu1 %v1588_v10 }
  0x9a   :  { %1322 = vmatprep.mubr.msk.bf16.mxu0 %vm450_vm0, %v1589_v11  ;;  %1338 = vmatprep.mubr.msk.bf16.mxu1 %vm450_vm0, %v1591_v12 }
  0xa1   :  { %707 = vmatmul.mubr.bf16.gmra.mrb[60].mxu0 %v1593_v13  ;;  %835 = vmatmul.mubr.bf16.gmra.mrb[60].mxu1 %v1594_v14 }
  0xfc   :  { %v588_v16 = vpop.f32.mrb[0].mxu0  ;;  %v716_v17 = vpop.f32.mrb[0].mxu1 }
  0xfd   :  { %v589_v18 = vadd.f32 %v1874_v15, %v588_v16  ;;  %v717_v19 = vadd.f32 %v1874_v15, %v716_v17  ;;  %v590_v20 = vpop.f32.mrb[1].mxu0  ;;  %v718_v21 = vpop.f32.mrb[1].mxu1 }
  0xfe   :  { %v591_v22 = vpop.f32.mrb[2].mxu0  ;;  %v719_v23 = vpop.f32.mrb[2].mxu1 }
  0xff   :  { %v843_v24 = vmax.f32 %v589_v18, 0.0  ;;  %v875_v25 = vmax.f32 %v717_v19, 0.0  ;;  %v592_v26 = vadd.f32 %v1874_v15, %v591_v22  ;;  %v720_v27 = vadd.f32 %v1874_v15, %v719_v23  ;;  %v593_v28 = vpop.f32.mrb[3].mxu0  ;;  %v721_v29 = vpop.f32.mrb[3].mxu1 }
 0x101   :  { %v1403_v30 = vpack.c.bf16 %v843_v24, %v843_v24  ;;  %v1435_v31 = vpack.c.bf16 %v875_v25, %v875_v25  ;;  %v844_v32 = vmax.f32 %v592_v26, 0.0  ;;  %v876_v33 = vmax.f32 %v720_v27, 0.0 }
 0x103   :  { %1164 = vst.msk [vmem:[%s2199_s3] sm:$0xf] %vm1163_vm3, %v1403_v30  ;;  %1196 = vst.msk [vmem:[%s2199_s3 + $0x80] sm:$0xf] %vm1163_vm3, %v1435_v31  ;;  %v1404_v34 = vpack.c.bf16 %v844_v32, %v844_v32  ;;  %v1436_v35 = vpack.c.bf16 %v876_v33, %v876_v33 }
 0x104   :  { %v596_v36 = vpop.f32.mrb[4].mxu0  ;;  %v724_v37 = vpop.f32.mrb[4].mxu1 }
 0x105   :  { %1165 = vst.msk [vmem:[%s2199_s3 + $0x4] sm:$0xf] %vm1163_vm3, %v1404_v34  ;;  %1197 = vst.msk [vmem:[%s2199_s3 + $0x84] sm:$0xf] %vm1163_vm3, %v1436_v35  ;;  %v597_v38 = vadd.f32 %v1874_v15, %v596_v36  ;;  %v725_v39 = vadd.f32 %v1874_v15, %v724_v37  ;;  %v598_v40 = vpop.f32.mrb[5].mxu0  ;;  %v726_v41 = vpop.f32.mrb[5].mxu1 }
 0x106   :  { %v599_v42 = vpop.f32.mrb[6].mxu0  ;;  %v727_v43 = vpop.f32.mrb[6].mxu1 }
 0x107   :  { %v845_v44 = vmax.f32 %v597_v38, 0.0  ;;  %v877_v45 = vmax.f32 %v725_v39, 0.0  ;;  %v600_v46 = vadd.f32 %v1874_v15, %v599_v42  ;;  %v728_v47 = vadd.f32 %v1874_v15, %v727_v43  ;;  %v601_v48 = vpop.f32.mrb[7].mxu0  ;;  %v729_v49 = vpop.f32.mrb[7].mxu1 }
 0x109   :  { %v1405_v50 = vpack.c.bf16 %v845_v44, %v845_v44  ;;  %v1437_v51 = vpack.c.bf16 %v877_v45, %v877_v45  ;;  %v846_v52 = vmax.f32 %v600_v46, 0.0  ;;  %v878_v53 = vmax.f32 %v728_v47, 0.0 }
 0x10b   :  { %1166 = vst.msk [vmem:[%s2199_s3 + $0x8] sm:$0xf] %vm1163_vm3, %v1405_v50  ;;  %1198 = vst.msk [vmem:[%s2199_s3 + $0x88] sm:$0xf] %vm1163_vm3, %v1437_v51  ;;  %v1406_v54 = vpack.c.bf16 %v846_v52, %v846_v52  ;;  %v1438_v55 = vpack.c.bf16 %v878_v53, %v878_v53 }
 0x10c   :  { %v604_v56 = vpop.f32.mrb[8].mxu0  ;;  %v732_v57 = vpop.f32.mrb[8].mxu1 }
 0x10d   :  { %1167 = vst.msk [vmem:[%s2199_s3 + $0xc] sm:$0xf] %vm1163_vm3, %v1406_v54  ;;  %1199 = vst.msk [vmem:[%s2199_s3 + $0x8c] sm:$0xf] %vm1163_vm3, %v1438_v55  ;;  %v605_v58 = vadd.f32 %v1874_v15, %v604_v56  ;;  %v733_v59 = vadd.f32 %v1874_v15, %v732_v57  ;;  %v606_v60 = vpop.f32.mrb[9].mxu0  ;;  %v734_v61 = vpop.f32.mrb[9].mxu1 }
 0x10e   :  { %v607_v62 = vpop.f32.mrb[10].mxu0  ;;  %v735_v63 = vpop.f32.mrb[10].mxu1 }
 0x10f   :  { %v847_v0 = vmax.f32 %v605_v58, 0.0  ;;  %v879_v1 = vmax.f32 %v733_v59, 0.0  ;;  %v608_v2 = vadd.f32 %v1874_v15, %v607_v62  ;;  %v736_v3 = vadd.f32 %v1874_v15, %v735_v63  ;;  %v609_v4 = vpop.f32.mrb[11].mxu0  ;;  %v737_v5 = vpop.f32.mrb[11].mxu1 }
 0x111   :  { %v1407_v6 = vpack.c.bf16 %v847_v0, %v847_v0  ;;  %v1439_v7 = vpack.c.bf16 %v879_v1, %v879_v1  ;;  %v848_v8 = vmax.f32 %v608_v2, 0.0  ;;  %v880_v9 = vmax.f32 %v736_v3, 0.0 }
 0x113   :  { %1168 = vst.msk [vmem:[%s2199_s3 + $0x10] sm:$0xf] %vm1163_vm3, %v1407_v6  ;;  %1200 = vst.msk [vmem:[%s2199_s3 + $0x90] sm:$0xf] %vm1163_vm3, %v1439_v7  ;;  %v1408_v10 = vpack.c.bf16 %v848_v8, %v848_v8  ;;  %v1440_v11 = vpack.c.bf16 %v880_v9, %v880_v9 }
 0x114   :  { %v612_v12 = vpop.f32.mrb[12].mxu0  ;;  %v740_v13 = vpop.f32.mrb[12].mxu1 }
 0x115   :  { %1169 = vst.msk [vmem:[%s2199_s3 + $0x14] sm:$0xf] %vm1163_vm3, %v1408_v10  ;;  %1201 = vst.msk [vmem:[%s2199_s3 + $0x94] sm:$0xf] %vm1163_vm3, %v1440_v11  ;;  %v613_v14 = vadd.f32 %v1874_v15, %v612_v12  ;;  %v741_v16 = vadd.f32 %v1874_v15, %v740_v13  ;;  %v614_v17 = vpop.f32.mrb[13].mxu0  ;;  %v742_v18 = vpop.f32.mrb[13].mxu1 }
 0x116   :  { %v615_v19 = vpop.f32.mrb[14].mxu0  ;;  %v743_v20 = vpop.f32.mrb[14].mxu1 }
 0x117   :  { %v849_v21 = vmax.f32 %v613_v14, 0.0  ;;  %v881_v22 = vmax.f32 %v741_v16, 0.0  ;;  %v616_v23 = vadd.f32 %v1874_v15, %v615_v19  ;;  %v744_v24 = vadd.f32 %v1874_v15, %v743_v20  ;;  %v617_v25 = vpop.f32.mrb[15].mxu0  ;;  %v745_v26 = vpop.f32.mrb[15].mxu1 }
 0x119   :  { %v1409_v27 = vpack.c.bf16 %v849_v21, %v849_v21  ;;  %v1441_v28 = vpack.c.bf16 %v881_v22, %v881_v22  ;;  %v850_v29 = vmax.f32 %v616_v23, 0.0  ;;  %v882_v30 = vmax.f32 %v744_v24, 0.0 }
 0x11b   :  { %1170 = vst.msk [vmem:[%s2199_s3 + $0x18] sm:$0xf] %vm1163_vm3, %v1409_v27  ;;  %1202 = vst.msk [vmem:[%s2199_s3 + $0x98] sm:$0xf] %vm1163_vm3, %v1441_v28  ;;  %v1410_v31 = vpack.c.bf16 %v850_v29, %v850_v29  ;;  %v1442_v32 = vpack.c.bf16 %v882_v30, %v882_v30 }
 0x11c   :  { %v620_v33 = vpop.f32.mrb[16].mxu0  ;;  %v748_v34 = vpop.f32.mrb[16].mxu1 }
 0x11d   :  { %1171 = vst.msk [vmem:[%s2199_s3 + $0x1c] sm:$0xf] %vm1163_vm3, %v1410_v31  ;;  %1203 = vst.msk [vmem:[%s2199_s3 + $0x9c] sm:$0xf] %vm1163_vm3, %v1442_v32  ;;  %v621_v35 = vadd.f32 %v1874_v15, %v620_v33  ;;  %v749_v36 = vadd.f32 %v1874_v15, %v748_v34  ;;  %v622_v37 = vpop.f32.mrb[17].mxu0  ;;  %v750_v38 = vpop.f32.mrb[17].mxu1 }
 0x11e   :  { %v623_v39 = vpop.f32.mrb[18].mxu0  ;;  %v751_v40 = vpop.f32.mrb[18].mxu1 }
 0x11f   :  { %v851_v41 = vmax.f32 %v621_v35, 0.0  ;;  %v883_v42 = vmax.f32 %v749_v36, 0.0  ;;  %v624_v43 = vadd.f32 %v1874_v15, %v623_v39  ;;  %v752_v44 = vadd.f32 %v1874_v15, %v751_v40  ;;  %v625_v45 = vpop.f32.mrb[19].mxu0  ;;  %v753_v46 = vpop.f32.mrb[19].mxu1 }
 0x121   :  { %v1411_v47 = vpack.c.bf16 %v851_v41, %v851_v41  ;;  %v1443_v48 = vpack.c.bf16 %v883_v42, %v883_v42  ;;  %v852_v49 = vmax.f32 %v624_v43, 0.0  ;;  %v884_v50 = vmax.f32 %v752_v44, 0.0 }
 0x123   :  { %1172 = vst.msk [vmem:[%s2199_s3 + $0x20] sm:$0xf] %vm1163_vm3, %v1411_v47  ;;  %1204 = vst.msk [vmem:[%s2199_s3 + $0xa0] sm:$0xf] %vm1163_vm3, %v1443_v48  ;;  %v1412_v51 = vpack.c.bf16 %v852_v49, %v852_v49  ;;  %v1444_v52 = vpack.c.bf16 %v884_v50, %v884_v50 }
 0x124   :  { %v628_v53 = vpop.f32.mrb[20].mxu0  ;;  %v756_v54 = vpop.f32.mrb[20].mxu1 }
 0x125   :  { %1173 = vst.msk [vmem:[%s2199_s3 + $0x24] sm:$0xf] %vm1163_vm3, %v1412_v51  ;;  %1205 = vst.msk [vmem:[%s2199_s3 + $0xa4] sm:$0xf] %vm1163_vm3, %v1444_v52  ;;  %v629_v55 = vadd.f32 %v1874_v15, %v628_v53  ;;  %v757_v56 = vadd.f32 %v1874_v15, %v756_v54  ;;  %v630_v57 = vpop.f32.mrb[21].mxu0  ;;  %v758_v58 = vpop.f32.mrb[21].mxu1 }
 0x126   :  { %v631_v59 = vpop.f32.mrb[22].mxu0  ;;  %v759_v60 = vpop.f32.mrb[22].mxu1 }
 0x127   :  { %v853_v61 = vmax.f32 %v629_v55, 0.0  ;;  %v885_v62 = vmax.f32 %v757_v56, 0.0  ;;  %v632_v63 = vadd.f32 %v1874_v15, %v631_v59  ;;  %v760_v0 = vadd.f32 %v1874_v15, %v759_v60  ;;  %v633_v1 = vpop.f32.mrb[23].mxu0  ;;  %v761_v2 = vpop.f32.mrb[23].mxu1 }
 0x129   :  { %v1413_v3 = vpack.c.bf16 %v853_v61, %v853_v61  ;;  %v1445_v4 = vpack.c.bf16 %v885_v62, %v885_v62  ;;  %v854_v5 = vmax.f32 %v632_v63, 0.0  ;;  %v886_v6 = vmax.f32 %v760_v0, 0.0 }
 0x12b   :  { %1174 = vst.msk [vmem:[%s2199_s3 + $0x28] sm:$0xf] %vm1163_vm3, %v1413_v3  ;;  %1206 = vst.msk [vmem:[%s2199_s3 + $0xa8] sm:$0xf] %vm1163_vm3, %v1445_v4  ;;  %v1414_v7 = vpack.c.bf16 %v854_v5, %v854_v5  ;;  %v1446_v8 = vpack.c.bf16 %v886_v6, %v886_v6 }
 0x12c   :  { %v636_v9 = vpop.f32.mrb[24].mxu0  ;;  %v764_v10 = vpop.f32.mrb[24].mxu1 }
 0x12d   :  { %1175 = vst.msk [vmem:[%s2199_s3 + $0x2c] sm:$0xf] %vm1163_vm3, %v1414_v7  ;;  %1207 = vst.msk [vmem:[%s2199_s3 + $0xac] sm:$0xf] %vm1163_vm3, %v1446_v8  ;;  %v637_v11 = vadd.f32 %v1874_v15, %v636_v9  ;;  %v765_v12 = vadd.f32 %v1874_v15, %v764_v10  ;;  %v638_v13 = vpop.f32.mrb[25].mxu0  ;;  %v766_v14 = vpop.f32.mrb[25].mxu1 }
 0x12e   :  { %v639_v16 = vpop.f32.mrb[26].mxu0  ;;  %v767_v17 = vpop.f32.mrb[26].mxu1 }
 0x12f   :  { %v855_v18 = vmax.f32 %v637_v11, 0.0  ;;  %v887_v19 = vmax.f32 %v765_v12, 0.0  ;;  %v640_v20 = vadd.f32 %v1874_v15, %v639_v16  ;;  %v768_v21 = vadd.f32 %v1874_v15, %v767_v17  ;;  %v641_v22 = vpop.f32.mrb[27].mxu0  ;;  %v769_v23 = vpop.f32.mrb[27].mxu1 }
 0x131   :  { %v1415_v24 = vpack.c.bf16 %v855_v18, %v855_v18  ;;  %v1447_v25 = vpack.c.bf16 %v887_v19, %v887_v19  ;;  %v856_v26 = vmax.f32 %v640_v20, 0.0  ;;  %v888_v27 = vmax.f32 %v768_v21, 0.0 }
 0x133   :  { %1176 = vst.msk [vmem:[%s2199_s3 + $0x30] sm:$0xf] %vm1163_vm3, %v1415_v24  ;;  %1208 = vst.msk [vmem:[%s2199_s3 + $0xb0] sm:$0xf] %vm1163_vm3, %v1447_v25  ;;  %v1416_v28 = vpack.c.bf16 %v856_v26, %v856_v26  ;;  %v1448_v29 = vpack.c.bf16 %v888_v27, %v888_v27 }
 0x134   :  { %v644_v30 = vpop.f32.mrb[28].mxu0  ;;  %v772_v31 = vpop.f32.mrb[28].mxu1 }
 0x135   :  { %1177 = vst.msk [vmem:[%s2199_s3 + $0x34] sm:$0xf] %vm1163_vm3, %v1416_v28  ;;  %1209 = vst.msk [vmem:[%s2199_s3 + $0xb4] sm:$0xf] %vm1163_vm3, %v1448_v29  ;;  %v645_v32 = vadd.f32 %v1874_v15, %v644_v30  ;;  %v773_v33 = vadd.f32 %v1874_v15, %v772_v31  ;;  %v646_v34 = vpop.f32.mrb[29].mxu0  ;;  %v774_v35 = vpop.f32.mrb[29].mxu1 }
 0x136   :  { %v647_v36 = vpop.f32.mrb[30].mxu0  ;;  %v775_v37 = vpop.f32.mrb[30].mxu1 }
 0x137   :  { %v857_v38 = vmax.f32 %v645_v32, 0.0  ;;  %v889_v39 = vmax.f32 %v773_v33, 0.0  ;;  %v648_v40 = vadd.f32 %v1874_v15, %v647_v36  ;;  %v776_v41 = vadd.f32 %v1874_v15, %v775_v37  ;;  %v649_v42 = vpop.f32.mrb[31].mxu0  ;;  %v777_v43 = vpop.f32.mrb[31].mxu1 }
 0x139   :  { %v1417_v44 = vpack.c.bf16 %v857_v38, %v857_v38  ;;  %v1449_v45 = vpack.c.bf16 %v889_v39, %v889_v39  ;;  %v858_v46 = vmax.f32 %v648_v40, 0.0  ;;  %v890_v47 = vmax.f32 %v776_v41, 0.0 }
 0x13b   :  { %1178 = vst.msk [vmem:[%s2199_s3 + $0x38] sm:$0xf] %vm1163_vm3, %v1417_v44  ;;  %1210 = vst.msk [vmem:[%s2199_s3 + $0xb8] sm:$0xf] %vm1163_vm3, %v1449_v45  ;;  %v1418_v48 = vpack.c.bf16 %v858_v46, %v858_v46  ;;  %v1450_v49 = vpack.c.bf16 %v890_v47, %v890_v47 }
 0x13c   :  { %v652_v50 = vpop.f32.mrb[32].mxu0  ;;  %v780_v51 = vpop.f32.mrb[32].mxu1 }
 0x13d   :  { %1179 = vst.msk [vmem:[%s2199_s3 + $0x3c] sm:$0xf] %vm1163_vm3, %v1418_v48  ;;  %1211 = vst.msk [vmem:[%s2199_s3 + $0xbc] sm:$0xf] %vm1163_vm3, %v1450_v49  ;;  %v653_v52 = vadd.f32 %v1874_v15, %v652_v50  ;;  %v781_v53 = vadd.f32 %v1874_v15, %v780_v51  ;;  %v654_v54 = vpop.f32.mrb[33].mxu0  ;;  %v782_v55 = vpop.f32.mrb[33].mxu1 }
 0x13e   :  { %v655_v56 = vpop.f32.mrb[34].mxu0  ;;  %v783_v57 = vpop.f32.mrb[34].mxu1 }
 0x13f   :  { %v859_v58 = vmax.f32 %v653_v52, 0.0  ;;  %v891_v59 = vmax.f32 %v781_v53, 0.0  ;;  %v656_v60 = vadd.f32 %v1874_v15, %v655_v56  ;;  %v784_v61 = vadd.f32 %v1874_v15, %v783_v57  ;;  %v657_v62 = vpop.f32.mrb[35].mxu0  ;;  %v785_v63 = vpop.f32.mrb[35].mxu1 }
 0x141   :  { %v1419_v0 = vpack.c.bf16 %v859_v58, %v859_v58  ;;  %v1451_v1 = vpack.c.bf16 %v891_v59, %v891_v59  ;;  %v860_v2 = vmax.f32 %v656_v60, 0.0  ;;  %v892_v3 = vmax.f32 %v784_v61, 0.0 }
 0x143   :  { %1180 = vst.msk [vmem:[%s2199_s3 + $0x40] sm:$0xf] %vm1163_vm3, %v1419_v0  ;;  %1212 = vst.msk [vmem:[%s2199_s3 + $0xc0] sm:$0xf] %vm1163_vm3, %v1451_v1  ;;  %v1420_v4 = vpack.c.bf16 %v860_v2, %v860_v2  ;;  %v1452_v5 = vpack.c.bf16 %v892_v3, %v892_v3 }
 0x144   :  { %v660_v6 = vpop.f32.mrb[36].mxu0  ;;  %v788_v7 = vpop.f32.mrb[36].mxu1 }
 0x145   :  { %1181 = vst.msk [vmem:[%s2199_s3 + $0x44] sm:$0xf] %vm1163_vm3, %v1420_v4  ;;  %1213 = vst.msk [vmem:[%s2199_s3 + $0xc4] sm:$0xf] %vm1163_vm3, %v1452_v5  ;;  %v661_v8 = vadd.f32 %v1874_v15, %v660_v6  ;;  %v789_v9 = vadd.f32 %v1874_v15, %v788_v7  ;;  %v662_v10 = vpop.f32.mrb[37].mxu0  ;;  %v790_v11 = vpop.f32.mrb[37].mxu1 }
 0x146   :  { %v663_v12 = vpop.f32.mrb[38].mxu0  ;;  %v791_v13 = vpop.f32.mrb[38].mxu1 }
 0x147   :  { %v861_v14 = vmax.f32 %v661_v8, 0.0  ;;  %v893_v16 = vmax.f32 %v789_v9, 0.0  ;;  %v664_v17 = vadd.f32 %v1874_v15, %v663_v12  ;;  %v792_v18 = vadd.f32 %v1874_v15, %v791_v13  ;;  %v665_v19 = vpop.f32.mrb[39].mxu0  ;;  %v793_v20 = vpop.f32.mrb[39].mxu1 }
 0x149   :  { %v1421_v21 = vpack.c.bf16 %v861_v14, %v861_v14  ;;  %v1453_v22 = vpack.c.bf16 %v893_v16, %v893_v16  ;;  %v862_v23 = vmax.f32 %v664_v17, 0.0  ;;  %v894_v24 = vmax.f32 %v792_v18, 0.0 }
 0x14b   :  { %1182 = vst.msk [vmem:[%s2199_s3 + $0x48] sm:$0xf] %vm1163_vm3, %v1421_v21  ;;  %1214 = vst.msk [vmem:[%s2199_s3 + $0xc8] sm:$0xf] %vm1163_vm3, %v1453_v22  ;;  %v1422_v25 = vpack.c.bf16 %v862_v23, %v862_v23  ;;  %v1454_v26 = vpack.c.bf16 %v894_v24, %v894_v24 }
 0x14c   :  { %v668_v27 = vpop.f32.mrb[40].mxu0  ;;  %v796_v28 = vpop.f32.mrb[40].mxu1 }
 0x14d   :  { %1183 = vst.msk [vmem:[%s2199_s3 + $0x4c] sm:$0xf] %vm1163_vm3, %v1422_v25  ;;  %1215 = vst.msk [vmem:[%s2199_s3 + $0xcc] sm:$0xf] %vm1163_vm3, %v1454_v26  ;;  %v669_v29 = vadd.f32 %v1874_v15, %v668_v27  ;;  %v797_v30 = vadd.f32 %v1874_v15, %v796_v28  ;;  %v670_v31 = vpop.f32.mrb[41].mxu0  ;;  %v798_v32 = vpop.f32.mrb[41].mxu1 }
 0x14e   :  { %v671_v33 = vpop.f32.mrb[42].mxu0  ;;  %v799_v34 = vpop.f32.mrb[42].mxu1 }
 0x14f   :  { %v863_v35 = vmax.f32 %v669_v29, 0.0  ;;  %v895_v36 = vmax.f32 %v797_v30, 0.0  ;;  %v672_v37 = vadd.f32 %v1874_v15, %v671_v33  ;;  %v800_v38 = vadd.f32 %v1874_v15, %v799_v34  ;;  %v673_v39 = vpop.f32.mrb[43].mxu0  ;;  %v801_v40 = vpop.f32.mrb[43].mxu1 }
 0x151   :  { %v1423_v41 = vpack.c.bf16 %v863_v35, %v863_v35  ;;  %v1455_v42 = vpack.c.bf16 %v895_v36, %v895_v36  ;;  %v864_v43 = vmax.f32 %v672_v37, 0.0  ;;  %v896_v44 = vmax.f32 %v800_v38, 0.0 }
 0x153   :  { %1184 = vst.msk [vmem:[%s2199_s3 + $0x50] sm:$0xf] %vm1163_vm3, %v1423_v41  ;;  %1216 = vst.msk [vmem:[%s2199_s3 + $0xd0] sm:$0xf] %vm1163_vm3, %v1455_v42  ;;  %v1424_v45 = vpack.c.bf16 %v864_v43, %v864_v43  ;;  %v1456_v46 = vpack.c.bf16 %v896_v44, %v896_v44 }
 0x154   :  { %v676_v47 = vpop.f32.mrb[44].mxu0  ;;  %v804_v48 = vpop.f32.mrb[44].mxu1 }
 0x155   :  { %1185 = vst.msk [vmem:[%s2199_s3 + $0x54] sm:$0xf] %vm1163_vm3, %v1424_v45  ;;  %1217 = vst.msk [vmem:[%s2199_s3 + $0xd4] sm:$0xf] %vm1163_vm3, %v1456_v46  ;;  %v677_v49 = vadd.f32 %v1874_v15, %v676_v47  ;;  %v805_v50 = vadd.f32 %v1874_v15, %v804_v48  ;;  %v678_v51 = vpop.f32.mrb[45].mxu0  ;;  %v806_v52 = vpop.f32.mrb[45].mxu1 }
 0x156   :  { %v679_v53 = vpop.f32.mrb[46].mxu0  ;;  %v807_v54 = vpop.f32.mrb[46].mxu1 }
 0x157   :  { %v865_v55 = vmax.f32 %v677_v49, 0.0  ;;  %v897_v56 = vmax.f32 %v805_v50, 0.0  ;;  %v680_v57 = vadd.f32 %v1874_v15, %v679_v53  ;;  %v808_v58 = vadd.f32 %v1874_v15, %v807_v54  ;;  %v681_v59 = vpop.f32.mrb[47].mxu0  ;;  %v809_v60 = vpop.f32.mrb[47].mxu1 }
 0x159   :  { %v1425_v61 = vpack.c.bf16 %v865_v55, %v865_v55  ;;  %v1457_v62 = vpack.c.bf16 %v897_v56, %v897_v56  ;;  %v866_v63 = vmax.f32 %v680_v57, 0.0  ;;  %v898_v0 = vmax.f32 %v808_v58, 0.0 }
 0x15b   :  { %1186 = vst.msk [vmem:[%s2199_s3 + $0x58] sm:$0xf] %vm1163_vm3, %v1425_v61  ;;  %1218 = vst.msk [vmem:[%s2199_s3 + $0xd8] sm:$0xf] %vm1163_vm3, %v1457_v62  ;;  %v1426_v1 = vpack.c.bf16 %v866_v63, %v866_v63  ;;  %v1458_v2 = vpack.c.bf16 %v898_v0, %v898_v0 }
 0x15c   :  { %v684_v3 = vpop.f32.mrb[48].mxu0  ;;  %v812_v4 = vpop.f32.mrb[48].mxu1 }
 0x15d   :  { %1187 = vst.msk [vmem:[%s2199_s3 + $0x5c] sm:$0xf] %vm1163_vm3, %v1426_v1  ;;  %1219 = vst.msk [vmem:[%s2199_s3 + $0xdc] sm:$0xf] %vm1163_vm3, %v1458_v2  ;;  %v685_v5 = vadd.f32 %v1874_v15, %v684_v3  ;;  %v813_v6 = vadd.f32 %v1874_v15, %v812_v4  ;;  %v686_v7 = vpop.f32.mrb[49].mxu0  ;;  %v814_v8 = vpop.f32.mrb[49].mxu1 }
 0x15e   :  { %v687_v9 = vpop.f32.mrb[50].mxu0  ;;  %v815_v10 = vpop.f32.mrb[50].mxu1 }
 0x15f   :  { %v867_v11 = vmax.f32 %v685_v5, 0.0  ;;  %v899_v12 = vmax.f32 %v813_v6, 0.0  ;;  %v688_v13 = vadd.f32 %v1874_v15, %v687_v9  ;;  %v816_v14 = vadd.f32 %v1874_v15, %v815_v10  ;;  %v689_v16 = vpop.f32.mrb[51].mxu0  ;;  %v817_v17 = vpop.f32.mrb[51].mxu1 }
 0x161   :  { %v1427_v18 = vpack.c.bf16 %v867_v11, %v867_v11  ;;  %v1459_v19 = vpack.c.bf16 %v899_v12, %v899_v12  ;;  %v868_v20 = vmax.f32 %v688_v13, 0.0  ;;  %v900_v21 = vmax.f32 %v816_v14, 0.0 }
 0x163   :  { %1188 = vst.msk [vmem:[%s2199_s3 + $0x60] sm:$0xf] %vm1163_vm3, %v1427_v18  ;;  %1220 = vst.msk [vmem:[%s2199_s3 + $0xe0] sm:$0xf] %vm1163_vm3, %v1459_v19  ;;  %v1428_v22 = vpack.c.bf16 %v868_v20, %v868_v20  ;;  %v1460_v23 = vpack.c.bf16 %v900_v21, %v900_v21 }
 0x164   :  { %v692_v24 = vpop.f32.mrb[52].mxu0  ;;  %v820_v25 = vpop.f32.mrb[52].mxu1 }
 0x165   :  { %1189 = vst.msk [vmem:[%s2199_s3 + $0x64] sm:$0xf] %vm1163_vm3, %v1428_v22  ;;  %1221 = vst.msk [vmem:[%s2199_s3 + $0xe4] sm:$0xf] %vm1163_vm3, %v1460_v23  ;;  %v693_v26 = vadd.f32 %v1874_v15, %v692_v24  ;;  %v821_v27 = vadd.f32 %v1874_v15, %v820_v25  ;;  %v694_v28 = vpop.f32.mrb[53].mxu0  ;;  %v822_v29 = vpop.f32.mrb[53].mxu1 }
 0x166   :  { %v695_v30 = vpop.f32.mrb[54].mxu0  ;;  %v823_v31 = vpop.f32.mrb[54].mxu1 }
 0x167   :  { %v869_v32 = vmax.f32 %v693_v26, 0.0  ;;  %v901_v33 = vmax.f32 %v821_v27, 0.0  ;;  %v696_v34 = vadd.f32 %v1874_v15, %v695_v30  ;;  %v824_v35 = vadd.f32 %v1874_v15, %v823_v31  ;;  %v697_v36 = vpop.f32.mrb[55].mxu0  ;;  %v825_v37 = vpop.f32.mrb[55].mxu1 }
 0x169   :  { %v1429_v38 = vpack.c.bf16 %v869_v32, %v869_v32  ;;  %v1461_v39 = vpack.c.bf16 %v901_v33, %v901_v33  ;;  %v870_v40 = vmax.f32 %v696_v34, 0.0  ;;  %v902_v41 = vmax.f32 %v824_v35, 0.0 }
 0x16b   :  { %1190 = vst.msk [vmem:[%s2199_s3 + $0x68] sm:$0xf] %vm1163_vm3, %v1429_v38  ;;  %1222 = vst.msk [vmem:[%s2199_s3 + $0xe8] sm:$0xf] %vm1163_vm3, %v1461_v39  ;;  %v1430_v42 = vpack.c.bf16 %v870_v40, %v870_v40  ;;  %v1462_v43 = vpack.c.bf16 %v902_v41, %v902_v41 }
 0x16c   :  { %v700_v44 = vpop.f32.mrb[56].mxu0  ;;  %v828_v45 = vpop.f32.mrb[56].mxu1 }
 0x16d   :  { %1191 = vst.msk [vmem:[%s2199_s3 + $0x6c] sm:$0xf] %vm1163_vm3, %v1430_v42  ;;  %1223 = vst.msk [vmem:[%s2199_s3 + $0xec] sm:$0xf] %vm1163_vm3, %v1462_v43  ;;  %v701_v46 = vadd.f32 %v1874_v15, %v700_v44  ;;  %v829_v47 = vadd.f32 %v1874_v15, %v828_v45  ;;  %v702_v48 = vpop.f32.mrb[57].mxu0  ;;  %v830_v49 = vpop.f32.mrb[57].mxu1 }
 0x16e   :  { %v703_v50 = vpop.f32.mrb[58].mxu0  ;;  %v831_v51 = vpop.f32.mrb[58].mxu1 }
 0x16f   :  { %v871_v52 = vmax.f32 %v701_v46, 0.0  ;;  %v903_v53 = vmax.f32 %v829_v47, 0.0  ;;  %v704_v54 = vadd.f32 %v1874_v15, %v703_v50  ;;  %v832_v55 = vadd.f32 %v1874_v15, %v831_v51  ;;  %v705_v56 = vpop.f32.mrb[59].mxu0  ;;  %v833_v57 = vpop.f32.mrb[59].mxu1 }
 0x171   :  { %v1431_v58 = vpack.c.bf16 %v871_v52, %v871_v52  ;;  %v1463_v59 = vpack.c.bf16 %v903_v53, %v903_v53  ;;  %v872_v60 = vmax.f32 %v704_v54, 0.0  ;;  %v904_v61 = vmax.f32 %v832_v55, 0.0 }
 0x173   :  { %1192 = vst.msk [vmem:[%s2199_s3 + $0x70] sm:$0xf] %vm1163_vm3, %v1431_v58  ;;  %1224 = vst.msk [vmem:[%s2199_s3 + $0xf0] sm:$0xf] %vm1163_vm3, %v1463_v59  ;;  %v1432_v62 = vpack.c.bf16 %v872_v60, %v872_v60  ;;  %v1464_v63 = vpack.c.bf16 %v904_v61, %v904_v61 }
 0x174   :  { %v708_v0 = vpop.f32.mrb[60].mxu0  ;;  %v836_v1 = vpop.f32.mrb[60].mxu1 }
 0x175   :  { %1193 = vst.msk [vmem:[%s2199_s3 + $0x74] sm:$0xf] %vm1163_vm3, %v1432_v62  ;;  %1225 = vst.msk [vmem:[%s2199_s3 + $0xf4] sm:$0xf] %vm1163_vm3, %v1464_v63  ;;  %v709_v2 = vadd.f32 %v1874_v15, %v708_v0  ;;  %v837_v3 = vadd.f32 %v1874_v15, %v836_v1  ;;  %v710_v4 = vpop.f32.mrb[61].mxu0  ;;  %v838_v5 = vpop.f32.mrb[61].mxu1 }
 0x176   :  { %v711_v6 = vpop.f32.mrb[62].mxu0  ;;  %v839_v7 = vpop.f32.mrb[62].mxu1 }
 0x177   :  { %v873_v8 = vmax.f32 %v709_v2, 0.0  ;;  %v905_v9 = vmax.f32 %v837_v3, 0.0  ;;  %v712_v10 = vadd.f32 %v1874_v15, %v711_v6  ;;  %v840_v11 = vadd.f32 %v1874_v15, %v839_v7  ;;  %v713_v12 = vpop.f32.mrb[63].mxu0  ;;  %v841_v13 = vpop.f32.mrb[63].mxu1 }
 0x179   :  { %v1433_v14 = vpack.c.bf16 %v873_v8, %v873_v8  ;;  %v1465_v16 = vpack.c.bf16 %v905_v9, %v905_v9  ;;  %v874_v17 = vmax.f32 %v712_v10, 0.0  ;;  %v906_v18 = vmax.f32 %v840_v11, 0.0 }
 0x17b   :  { %1194 = vst.msk [vmem:[%s2199_s3 + $0x78] sm:$0xf] %vm1163_vm3, %v1433_v14  ;;  %1226 = vst.msk [vmem:[%s2199_s3 + $0xf8] sm:$0xf] %vm1163_vm3, %v1465_v16  ;;  %v1434_v19 = vpack.c.bf16 %v874_v17, %v874_v17  ;;  %v1466_v20 = vpack.c.bf16 %v906_v18, %v906_v18 }
 0x17d   :  { %1195 = vst.msk [vmem:[%s2199_s3 + $0x7c] sm:$0xf] %vm1163_vm3, %v1434_v19  ;;  %1227 = vst.msk [vmem:[%s2199_s3 + $0xfc] sm:$0xf] %vm1163_vm3, %v1466_v20 }

</bundles_post_ra>
